<compile_context>
chip_gen: v6e
topology: v6e:2x2x1
jax: 0.10.0
libtpu: 0.0.40
codegen_flags: <defaults>
</compile_context>

<pallas_src>
import jax
import jax.numpy as jnp
from jax import lax
from jax.experimental import pallas as pl
from jax.experimental.pallas import tpu as pltpu


def _rope_kernel(cos_ref, sin_ref, x_ref, o_ref):
    """One (ts, h*d) tile: out = x*cos + pairswap(x)*sin_signed.

    cos_ref / sin_ref are per-head-dim tables of shape (ts, d); they are
    broadcast across the h heads in-register.
    """
    x = x_ref[...]                                   # (ts, hd), input dtype
    hd = x.shape[-1]
    d = cos_ref.shape[-1]
    h = hd // d

    # pairwise swap along lanes: rot[2i] = x[2i+1], rot[2i+1] = x[2i]
    lane = lax.broadcasted_iota(jnp.int32, (1, hd), 1)   # single-row parity mask
    even = (lane & 1) == 0
    x_next = pltpu.roll(x, shift=hd - 1, axis=1)     # lane l -> x[(l+1) % hd]
    x_prev = pltpu.roll(x, shift=1, axis=1)          # lane l -> x[(l-1) % hd]
    rot = jnp.where(even, x_next, x_prev)
    # wrap-around lanes are never selected: parity keeps each pairing inside
    # its (2i, 2i+1) pair, hence inside each head as well.

    cos = cos_ref[...]                               # (ts, d) f32
    sin = sin_ref[...]                               # (ts, d) f32, sign-folded
    if h > 1:
        cos = jnp.tile(cos, (1, h))                  # broadcast across heads
        sin = jnp.tile(sin, (1, h))

    xf = x.astype(jnp.float32)
    rotf = rot.astype(jnp.float32)
    # sin is pre-signed (-sin on even lanes, +sin on odd), so this equals
    #   out[2i]   = x[2i]  *cos_i - x[2i+1]*sin_i
    #   out[2i+1] = x[2i+1]*cos_i + x[2i]  *sin_i
    o_ref[...] = (xf * cos + rotf * sin).astype(o_ref.dtype)


def make_rope_tables(seq_len, head_dim, base=10000.0):
    """(seq, head_dim) f32 cos table and sign-folded sin table.

    Compute once per (seq_len, head_dim, base) and pass via `tables=` to
    avoid re-materializing them in HBM on every call.
    """
    i = jnp.arange(head_dim // 2, dtype=jnp.float32)
    thetas = jnp.power(jnp.float32(base), -2.0 * i / jnp.float32(head_dim))
    m = jnp.arange(seq_len, dtype=jnp.float32)
    ang = m[:, None] * thetas[None, :]                                # (s, d/2)
    cos = jnp.repeat(jnp.cos(ang), 2, axis=1)                         # (s, d)
    sign = jnp.tile(jnp.array([-1.0, 1.0], jnp.float32), head_dim // 2)
    sin = jnp.repeat(jnp.sin(ang), 2, axis=1) * sign[None, :]         # (s, d)
    return cos, sin


def _choose_tiling(seq_len, hd, itemsize, target_block_bytes):
    """Seq tile (multiple of 8) targeting ~target_block_bytes per x block,
    plus the padded seq length (multiple of the tile)."""
    max_rows = max(8, (target_block_bytes // max(1, hd * itemsize)) // 8 * 8)
    ts = min(max_rows, ((seq_len + 7) // 8) * 8)
    ts = max(8, (ts // 8) * 8)
    s_pad = ((seq_len + ts - 1) // ts) * ts
    return ts, s_pad


def rotary_positional_embedding(x, base=10000.0, target_block_bytes=4 << 20,
                                tables=None):
    """x: (batch, seq_len, num_heads, head_dim) -> RoPE-rotated tensor, same shape."""
    b, s, h, d = x.shape
    assert d % 2 == 0, "head_dim must be even"
    hd = h * d
    itemsize = jnp.dtype(x.dtype).itemsize

    # ---- tiling: MiB-scale, lane-dense (ts, h*d) blocks; seq padded so the
    #      tile is always a multiple of 8 ---------------------------------
    ts, s_pad = _choose_tiling(s, hd, itemsize, target_block_bytes)
    seq_blocks = s_pad // ts

    # ---- (seq, d) angle tables (f32); NOT replicated across heads ---------
    if tables is None:
        cos_sd, sin_sd = make_rope_tables(s_pad, d, base)
    else:
        cos_sd, sin_sd = tables
        if cos_sd.shape[0] < s_pad:
            pad = s_pad - cos_sd.shape[0]
            cos_sd = jnp.pad(cos_sd, ((0, pad), (0, 0)))
            sin_sd = jnp.pad(sin_sd, ((0, pad), (0, 0)))
        else:
            cos_sd = cos_sd[:s_pad]
            sin_sd = sin_sd[:s_pad]
    cos_sd = cos_sd.astype(jnp.float32)
    sin_sd = sin_sd.astype(jnp.float32)

    xp = x
    if s_pad != s:
        xp = jnp.pad(x, ((0, 0), (0, s_pad - s), (0, 0), (0, 0)))
    xf = xp.reshape(b * s_pad, hd)

    # vmem limit derived from the actual double-buffered block footprint
    # (+ headroom), capped well under v7x's 64 MiB physical VMEM.
    block_bytes = 2 * ts * hd * itemsize + 2 * ts * d * 4   # x + out + cos + sin
    vmem_limit = int(min(max(2 * block_bytes + (4 << 20), 16 << 20), 48 << 20))

    out = pl.pallas_call(
        _rope_kernel,
        out_shape=jax.ShapeDtypeStruct((b * s_pad, hd), x.dtype),
        grid_spec=pltpu.PrefetchScalarGridSpec(
            num_scalar_prefetch=0,
            # batch innermost: cos/sin block index is constant across it, so
            # the tables are only re-fetched when the seq block changes.
            grid=(seq_blocks, b),
            in_specs=[
                pl.BlockSpec((ts, d), lambda si, bi: (si, 0)),                     # cos (s, d)
                pl.BlockSpec((ts, d), lambda si, bi: (si, 0)),                     # sin (s, d), signed
                pl.BlockSpec((ts, hd), lambda si, bi: (bi * seq_blocks + si, 0)),  # x
            ],
            out_specs=pl.BlockSpec(
                (ts, hd), lambda si, bi: (bi * seq_blocks + si, 0)),
        ),
        compiler_params=pltpu.CompilerParams(
            # seq axis parallel (megacore shards halves of the table range),
            # batch axis arbitrary (keeps the cross-batch table DMA-skip).
            dimension_semantics=("parallel", "arbitrary"),
            vmem_limit_bytes=vmem_limit,
        ),
    )(cos_sd, sin_sd, xf)

    out = out.reshape(b, s_pad, h, d)
    if s_pad != s:
        out = out[:, :s]
    return out


def _rope_reference(x, base=10000.0):
    """Pure-JAX reference matching the PyTorch forward semantics."""
    b, s, h, d = x.shape
    i = jnp.arange(d // 2, dtype=jnp.float32)
    thetas = jnp.power(jnp.float32(base), -2.0 * i / jnp.float32(d))
    ms = jnp.arange(s, dtype=jnp.float32)
    ang = ms[:, None] * thetas[None, :]               # (s, d/2)
    cos = jnp.cos(ang)[None, :, None, :]              # (1, s, 1, d/2)
    sin = jnp.sin(ang)[None, :, None, :]
    xg = x.astype(jnp.float32).reshape(b, s, h, d // 2, 2)
    x0, x1 = xg[..., 0], xg[..., 1]
    out0 = x0 * cos - x1 * sin
    out1 = x1 * cos + x0 * sin
    return jnp.stack([out0, out1], axis=-1).reshape(b, s, h, d).astype(x.dtype)


if __name__ == "__main__":
    k0, k1 = jax.random.split(jax.random.PRNGKey(0), 2)

    batch, seq, heads, head_dim = 2, 8, 4, 32
    x = jax.random.normal(k0, (batch, seq, heads, head_dim), dtype=jnp.float32)

    out = jax.block_until_ready(rotary_positional_embedding(x))
    ref = _rope_reference(x)
    assert out.shape == x.shape
    assert jnp.allclose(out, ref, atol=1e-5, rtol=1e-5), "mismatch vs reference"

    # awkward (non-multiple-of-8) seq_len exercises the padded-tile path
    x2 = jax.random.normal(k1, (1, 13, 4, 32), dtype=jnp.float32)
    out2 = jax.block_until_ready(rotary_positional_embedding(x2))
    ref2 = _rope_reference(x2)
    assert out2.shape == x2.shape
    assert jnp.allclose(out2, ref2, atol=1e-5, rtol=1e-5), "mismatch (padded path)"

    print("KERNEL_OK")
</pallas_src>

<mosaic_0001>
module attributes {stable_mosaic.version = 11 : i64} {
  func.func @_rope_kernel(%arg0: i32, %arg1: i32, %arg2: memref<8x32xf32, #tpu.memory_space<vmem>>, %arg3: memref<8x32xf32, #tpu.memory_space<vmem>>, %arg4: memref<8x128xf32, #tpu.memory_space<vmem>>, %arg5: memref<8x128xf32, #tpu.memory_space<vmem>>) attributes {dimension_semantics = [#tpu.dimension_semantics<parallel>, #tpu.dimension_semantics<arbitrary>], iteration_bounds = array<i64: 1, 2>, scalar_prefetch = 0 : i64, scratch_operands = 0 : i64, tpu.core_type = #tpu.core_type<tc>, window_params = [{transform_indices = @transform_0, window_bounds = array<i64: 8, 32>}, {transform_indices = @transform_1, window_bounds = array<i64: 8, 32>}, {transform_indices = @transform_2, window_bounds = array<i64: 8, 128>}, {transform_indices = @transform_3, window_bounds = array<i64: 8, 128>}]} {
    %c0 = arith.constant 0 : index
    %c0_0 = arith.constant 0 : index
    %0 = vector.load %arg4[%c0, %c0_0] : memref<8x128xf32, #tpu.memory_space<vmem>>, vector<8x128xf32>
    %1 = tpu.iota {dimensions = array<i32: 1>} : vector<1x128xi32>
    %c1_i32 = arith.constant 1 : i32
    %2 = vector.broadcast %c1_i32 : i32 to vector<1x128xi32>
    %3 = arith.andi %1, %2 : vector<1x128xi32>
    %c0_i32 = arith.constant 0 : i32
    %4 = vector.broadcast %c0_i32 : i32 to vector<1x128xi32>
    %5 = arith.cmpi eq, %3, %4 : vector<1x128xi32>
    %c127_i32 = arith.constant 127 : i32
    %6 = tpu.dynamic_rotate %0 by %c127_i32 dim 1 : vector<8x128xf32>, i32 -> vector<8x128xf32>
    %c1_i32_1 = arith.constant 1 : i32
    %7 = tpu.dynamic_rotate %0 by %c1_i32_1 dim 1 : vector<8x128xf32>, i32 -> vector<8x128xf32>
    %8 = vector.shape_cast %5 : vector<1x128xi1> to vector<1x128xi1>
    %9 = vector.broadcast %8 : vector<1x128xi1> to vector<8x128xi1>
    %10 = arith.select %9, %6, %7 : vector<8x128xi1>, vector<8x128xf32>
    %c0_2 = arith.constant 0 : index
    %c0_3 = arith.constant 0 : index
    %11 = vector.load %arg2[%c0_2, %c0_3] : memref<8x32xf32, #tpu.memory_space<vmem>>, vector<8x32xf32>
    %c0_4 = arith.constant 0 : index
    %c0_5 = arith.constant 0 : index
    %12 = vector.load %arg3[%c0_4, %c0_5] : memref<8x32xf32, #tpu.memory_space<vmem>>, vector<8x32xf32>
    %13 = tpu.concatenate %11, %11, %11, %11 in 1 : vector<8x32xf32>, vector<8x32xf32>, vector<8x32xf32>, vector<8x32xf32> -> vector<8x128xf32>
    %14 = tpu.concatenate %12, %12, %12, %12 in 1 : vector<8x32xf32>, vector<8x32xf32>, vector<8x32xf32>, vector<8x32xf32> -> vector<8x128xf32>
    %15 = arith.mulf %0, %13 : vector<8x128xf32>
    %16 = arith.mulf %10, %14 : vector<8x128xf32>
    %17 = arith.addf %15, %16 : vector<8x128xf32>
    %c0_6 = arith.constant 0 : index
    %c0_7 = arith.constant 0 : index
    %18 = vector.load %arg5[%c0_6, %c0_7] : memref<8x128xf32, #tpu.memory_space<vmem>>, vector<8x128xf32>
    tpu.vector_store %arg5[%c0_6, %c0_7], %17 {strides = array<i32>} : memref<8x128xf32, #tpu.memory_space<vmem>>, vector<8x128xf32>,
    return
  }
  func.func @transform_0(%arg0: i32, %arg1: i32) -> (i32, i32) {
    %c0_i32 = arith.constant 0 : i32
    %c0_i32_0 = arith.constant 0 : i32
    return %arg0, %c0_i32 : i32, i32
  }
  func.func @transform_1(%arg0: i32, %arg1: i32) -> (i32, i32) {
    %c0_i32 = arith.constant 0 : i32
    %c0_i32_0 = arith.constant 0 : i32
    return %arg0, %c0_i32 : i32, i32
  }
  func.func @transform_2(%arg0: i32, %arg1: i32) -> (i32, i32) {
    %c1_i32 = arith.constant 1 : i32
    %0 = arith.muli %arg1, %c1_i32 : i32
    %1 = arith.addi %0, %arg0 : i32
    %c0_i32 = arith.constant 0 : i32
    %c0_i32_0 = arith.constant 0 : i32
    return %1, %c0_i32 : i32, i32
  }
  func.func @transform_3(%arg0: i32, %arg1: i32) -> (i32, i32) {
    %c1_i32 = arith.constant 1 : i32
    %0 = arith.muli %arg1, %c1_i32 : i32
    %1 = arith.addi %0, %arg0 : i32
    %c0_i32 = arith.constant 0 : i32
    %c0_i32_0 = arith.constant 0 : i32
    return %1, %c0_i32 : i32, i32
  }
}

</mosaic_0001>

<bundles_post_ra>
// kernel: tpu_custom_call.1
= control target key start
LH: loop header
LB: loop body
LE: loop exit
PB: predicated region body
PF: predicated region fallthrough
CT: control target
= control target key end

     0   :  { %8 = vsyncpa [#allocation3], 0  ;;  %s888_s0 = inlined_call_operand.hbm [shape: f32[8,32], index: 0, kind: input, shape index: {}]   ;;  %s889_s1 = inlined_call_operand.hbm [shape: f32[8,32], index: 1, kind: input, shape index: {}]   ;;  %s890_s2 = inlined_call_operand.hbm [shape: f32[16,128], index: 2, kind: input, shape index: {}]   ;;  %s891_s3 = inlined_call_operand.hbm [shape: f32[16,128], index: 3, kind: output, shape index: {}]  }
   0x1   :  { %9 = vsyncpa [#allocation6], 0 }
   0x2   :  { %10 = vsyncpa [#allocation4], 0 }
   0x3   :  { %12 = vsyncpa [#allocation4 + $0x1], 0  ;;  %s711_s12 = smov 0   ;;  %s713_s13 = smov 0  }
   0x4   :  { %s715_s14 = smov 0   ;;  %s717_s15 = smov 0  }
   0x5   :  { %s719_s16 = smov 0   ;;  %s721_s17 = smov 0  }
   0x6 LB: > { %s742_s18 = sadd.s32 4294967295, %s680_s17   ;;  %s408_s19 = sadd.s32 4294967294, %s680_s17   ;;  %s680_s17 = sphi %s721_s17, %s18_s17   ;;  %s676_s16 = sphi %s719_s16, %s914_s16   ;;  %s672_s15 = sphi %s717_s15, %s913_s15   ;;  %s668_s14 = sphi %s715_s14, %s912_s14   ;;  %s664_s13 = sphi %s713_s13, %s911_s13   ;;  %s660_s12 = sphi %s711_s12, %s910_s12  }
   0x7   : > { %p104_p0 = scmp.ne.s32.totalorder %s664_s13, %s660_s12  ;;  %p892_p1 = scmp.eq.s32.totalorder %s742_s18, 0 }
   0x8   : > { %p136_p3 = scmp.eq.s32.totalorder %s408_s19, 1  ;;  %p409_p5 = scmp.ge.s32.totalorder %s680_s17, 1 }
   0x9   : > { %p751_p4 = por %p892_p1, %p104_p0  ;;  %p143_p7 = scmp.lt.s32.totalorder %s680_s17, 3 }
   0xa   : > { %p756_p6 = por %p136_p3, %p104_p0  ;;  %s682_s23 = smov [#allocation2]  }
   0xb   : > { %s895_s20 = scalar_select %p751_p4, 1, 0 }
   0xc   : > { %s896_s21 = scalar_select %p756_p6, 1, 0 }
   0xd   : > { %p761_p8 = pnand %p409_p5, %p143_p7  ;;  %s158_s24 = sshll.u32 %s682_s23, 4  ;;  %s159_s24 = int_to_ptr.vmem [resolvable:$true] %s158_s24 }
   0xe   : > { %s683_s25 = smov [#allocation5]   ;;  %s523_s28 = scalar_lea.vmem %s159_s24, 128 }
   0xf   : > { %s897_s22 = scalar_select %p761_p8, 1, 0 }
  0x10   : > { %p436_p10 = pneg %p761_p8  ;;  %s171_s26 = sshll.u32 %s683_s25, 4  ;;  %s172_s26 = int_to_ptr.vmem [resolvable:$true] %s171_s26 }
  0x11   : > { %p524_p13 = scmp.ne.s32.totalorder %s159_s24, %s523_s28  ;;  %p531_p5 = scmp.lt.s32.totalorder %s159_s24, %s159_s24 }
  0x12   : > { %p770_p11 = pnand %p436_p10, %p892_p1  ;;  %p532_p7 = scmp.lt.s32.totalorder %s523_s28, %s523_s28 }
  0x14   : > { %p514_p12 = pneg %p770_p11  ;;  %p533_p9 = por %p532_p7, %p531_p5 }
  0x16   : > { %p526_p0 = pnand %p524_p13, %p514_p12 }
  0x18   : > { %p527_p3 = pneg %p526_p0 }
  0x1a   : > { %p534_p2 = pnand %p533_p9, %p527_p3 }
  0x1c   : > { %537 = shalt.err (!%p534_p2)
}
  0x1d   : > { %439 = dma.hbm_to_vmem [thread:$0]  (!%p770_p11), %s888_s0, 128, %s159_s24, [#allocation3]  }
  0x1e   : > { %s549_s4 = scalar_lea.vmem %s172_s26, 128  ;;  %p557_p13 = scmp.lt.s32.totalorder %s172_s26, %s172_s26 }
  0x1f   : > { %p550_p10 = scmp.ne.s32.totalorder %s172_s26, %s549_s4  ;;  %p558_p0 = scmp.lt.s32.totalorder %s549_s4, %s549_s4 }
  0x21   : > { %p552_p1 = pnand %p550_p10, %p514_p12  ;;  %p559_p4 = por %p558_p0, %p557_p13 }
  0x23   : > { %p553_p6 = pneg %p552_p1 }
  0x25   : > { %p560_p8 = pnand %p559_p4, %p553_p6 }
  0x27   : > { %563 = shalt.err (!%p560_p8)
}
  0x28   : > { %442 = dma.hbm_to_vmem [thread:$0]  (!%p770_p11), %s889_s1, 128, %s172_s26, [#allocation6]  }
  0x29   : > { %s27_s7 = sadd.s32 1, %s676_s16  ;;  %s91_s8 = sadd.s32 1, %s668_s14 }
  0x2a   : > { %p28_p1 = scmp.ge.s32.totalorder %s27_s7, 2  ;;  %p98_p2 = scmp.ne.s32.totalorder %s668_s14, %s664_s13 }
  0x2b   : > { %p99_p4 = scmp.eq.s32.totalorder %s680_s17, 0  ;;  %p453_p6 = scmp.lt.s32.totalorder %s680_s17, 2 }
  0x2c   : > { %s916_s7 = smov (%p28_p1, %s27_s7), 0  ;;  %p899_p9 = scmp.eq.s32.totalorder %s742_s18, 1 }
  0x2d   : > { %p100_p8 = por %p99_p4, %p98_p2  ;;  %s88_s10 = ssub.s32 %s676_s16, %s916_s7 }
  0x2e   : > { %p802_p12 = por %p899_p9, %p98_p2  ;;  %s182_s11 = sand.u32 1, %s680_s17  }
  0x2f   : > { %p89_p3 = scmp.eq.s32.totalorder %s88_s10, 0  ;;  %s184_s19 = sand.u32 1, %s668_s14  }
  0x30   : > { %s414_s23 = sshll.u32 %s676_s16, 7  ;;  %s413_s25 = sshll.u32 %s184_s19, 3 }
  0x31   : > { %s812_s24 = scalar_select %p89_p3, %s668_s14, %s91_s8  }
  0x32   : > { %s192_s28 = scalar_lea.hbm %s890_s2, %s414_s23  ;;  %p817_p11 = pnand %p453_p6, %p100_p8 }
  0x33   : > { %s186_s30 = scalar_lea.vmem [#allocation7], %s413_s25  ;;  %s183_s5 = scalar_lea.sflag [#allocation3], %s182_s11 }
  0x34   : > { %s194_s4 = sshll.u32 %s186_s30, 4  ;;  %p566_p5 = pneg %p817_p11  ;;  %s195_s4 = int_to_ptr.vmem [resolvable:$true] %s194_s4 }
  0x35   : > { %s577_s6 = scalar_lea.vmem %s195_s4, 128  ;;  %s684_s8 = smov [#allocation7]  }
  0x36   : > { %p578_p7 = scmp.ne.s32.totalorder %s195_s4, %s577_s6  ;;  %s582_s10 = sshll.u32 %s684_s8, 4  ;;  %s583_s10 = int_to_ptr.vmem [resolvable:$false] %s582_s10 }
  0x37   : > { %s584_s19 = scalar_lea.vmem %s583_s10, 256  ;;  %p585_p0 = scmp.lt.s32.totalorder %s195_s4, %s583_s10 }
  0x38   : > { %p580_p10 = pnand %p578_p7, %p566_p5  ;;  %p586_p1 = scmp.lt.s32.totalorder %s584_s19, %s577_s6 }
  0x3a   : > { %p581_p13 = pneg %p580_p10  ;;  %p587_p2 = por %p586_p1, %p585_p0 }
  0x3c   : > { %p588_p4 = pnand %p587_p2, %p581_p13 }
  0x3e   : > { %591 = shalt.err (!%p588_p4)
}
  0x3f   : > { %446 = dma.hbm_to_vmem [thread:$0]  (!%p817_p11), %s192_s28, 128, %s195_s4, %s183_s5  }
  0x40   : > { %p902_p6 = scmp.ne.s32.totalorder %s897_s22, 0 }
  0x41   : > { %p903_p8 = scmp.eq.s32.totalorder (!%p902_p6), %s742_s18, 0 }
  0x42   : > { %203 = sbr.rel (%p902_p6) target bundleno = 226 (0xe2), region = 32 }
  0x47   : > { %643 = dma.done.wait (%p903_p8), [#allocation3], 128   ;;  %p904_p9 = pmov %p903_p8 }
  0x48   : > { %p905_p3 = pmov %p903_p8 }
  0x49   : > { %645 = vsyncadd (%p904_p9), [#allocation3], 4294967168 }
  0x4a   : > { %647 = dma.done.wait (%p905_p3), [#allocation6], 128   ;;  %p906_p5 = pmov %p905_p3 }
  0x4b   : > { %s213_s11 = sand.u32 1, %s742_s18   ;;  %s215_s23 = sand.u32 1, %s664_s13  }
  0x4c   : > { %649 = vsyncadd (%p906_p5), [#allocation6], 4294967168  ;;  %s839_s22 = sshll.u32 %s215_s23, 3  ;;  %s214_s25 = scalar_lea.sflag [#allocation3], %s213_s11 }
  0x4d   : > { %s217_s26 = scalar_lea.vmem [#allocation7], %s839_s22  ;;  %p907_p11 = scmp.ne.s32.totalorder %s895_s20, 0 }
  0x4f   : > { %651 = dma.done.wait (%p907_p11), %s214_s25, 128  }
  0x50   : > { %653 = vsyncadd (%p907_p11), %s214_s25, 4294967168  ;;  %v254_v0 = vld [vmem:[#allocation2] sm:$0xff]  ;;  %s685_s27 = smov 64   ;;  %s686_s28 = smov 32   ;;  %v255_v1 = vld [vmem:[#allocation5] sm:$0xff]  ;;  %v243_v3 = vlaneseq  ;;  %vm266_vm0 = vcmask 261120  }
  0x51   : > { %260 = vrot.lane.b32.xlu1 %v254_v0, %s685_s27  ;;  %257 = vrot.lane.b32.xlu0 %v254_v0, %s686_s28  ;;  %v242_v2 = vld [vmem:[%s217_s26] sm:$0xff]  ;;  %s687_s18 = smov 1   ;;  %s688_s29 = smov 127   ;;  %vm268_vm1 = vcmask 523264   ;;  %vm270_vm3 = vcmask 785408  }
  0x52   : > { %s689_s30 = smov 96   ;;  %v244_v6 = vand.u32 127, %v243_v3  ;;  %s421_s20 = sshll.u32 %s672_s15, 7 }
  0x53   : > { %s239_s4 = scalar_lea.vmem [#allocation8], %s839_s22  ;;  %s302_s10 = scalar_lea.hbm %s891_s3, %s421_s20 }
  0x54   : > { %v245_v9 = vand.u32 1, %v244_v6  ;;  %s304_s5 = sshll.u32 %s239_s4, 4  ;;  %s290_s19 = scalar_lea.sflag [#allocation4], %s215_s23  ;;  %s305_s5 = int_to_ptr.vmem [resolvable:$true] %s304_s5 }
  0x55   : > { %276 = vrot.lane.b32.xlu1 %v255_v1, %s685_s27  ;;  %273 = vrot.lane.b32.xlu0 %v255_v1, %s686_s28  ;;  %s592_s11 = scalar_lea.vmem %s305_s5, 128  ;;  %s690_s25 = smov [#allocation8]  }
  0x56   : > { %vm246_vm2 = vcmp.eq.s32.totalorder %v245_v9, 0  ;;  %p593_p7 = scmp.ne.s32.totalorder %s305_s5, %s592_s11  ;;  %s596_s15 = sshll.u32 %s690_s25, 4  ;;  %s597_s15 = int_to_ptr.vmem [resolvable:$false] %s596_s15 }
  0x57   : > { %s598_s22 = scalar_lea.vmem %s597_s15, 256  ;;  %p599_p0 = scmp.lt.s32.totalorder %s305_s5, %s597_s15 }
  0x58   : > { %p594_p10 = pnand %p593_p7, %p802_p12  ;;  %p600_p1 = scmp.lt.s32.totalorder %s598_s22, %s592_s11 }
  0x59   : > { %249 = vrot.lane.b32.xlu1 %v242_v2, %s687_s18  ;;  %247 = vrot.lane.b32.xlu0 %v242_v2, %s688_s29 }
  0x5a   : > { %p595_p13 = pneg %p594_p10  ;;  %p601_p2 = por %p600_p1, %p599_p0 }
  0x5c   : > { %p602_p4 = pnand %p601_p2, %p595_p13 }
  0x5d   : > { %279 = vrot.lane.b32.xlu1 %v255_v1, %s689_s30  ;;  %263 = vrot.lane.b32.xlu0 %v254_v0, %s689_s30 }
  0xc3   : > { %v261_v4 = vpop.permute.xlu1 %260  ;;  %v258_v5 = vpop.permute.xlu0 %257 }
  0xc4   : > { %v267_v12 = vsel %vm266_vm0, %v254_v0, %v258_v5 }
  0xc5   : > { %v269_v16 = vsel %vm268_vm1, %v267_v12, %v261_v4 }
  0xc7   : > { %v277_v7 = vpop.permute.xlu1 %276  ;;  %v274_v8 = vpop.permute.xlu0 %273 }
  0xc8   : > { %v282_v13 = vsel %vm266_vm0, %v255_v1, %v274_v8 }
  0xc9   : > { %v283_v14 = vsel %vm268_vm1, %v282_v13, %v277_v7 }
  0xcb   : > { %v250_v10 = vpop.permute.xlu1 %249  ;;  %v248_v11 = vpop.permute.xlu0 %247 }
  0xcc   : > { %v253_v18 = vsel %vm246_vm2, %v248_v11, %v250_v10 }
  0xcf   : > { %v280_v15 = vpop.permute.xlu1 %279  ;;  %v264_v17 = vpop.permute.xlu0 %263 }
  0xd0   : > { %v284_v19 = vsel %vm270_vm3, %v283_v14, %v280_v15  ;;  %v271_v20 = vsel %vm270_vm3, %v269_v16, %v264_v17 }
  0xd1   : > { %v286_v21 = vmul.f32 %v284_v19, %v253_v18  ;;  %v285_v22 = vmul.f32 %v271_v20, %v242_v2 }
  0xd3   : > { %v287_v23 = vadd.f32 %v286_v21, %v285_v22 }
  0xd5   : > { %288 = vst [vmem:[%s239_s4] sm:$0xff] %v287_v23 }
  0xd6   : > { %605 = shalt.err (!%p602_p4)
}
  0xd7   : > { %s606_s26 = scalar_lea.hbm %s302_s10, 128  ;;  %s610_s28 = scalar_lea.hbm %s891_s3, 256 }
  0xd8   : > { %p607_p6 = scmp.ne.s32.totalorder %s302_s10, %s606_s26  ;;  %p611_p3 = scmp.lt.s32.totalorder %s302_s10, %s891_s3 }
  0xd9   : > { %p612_p5 = scmp.lt.s32.totalorder %s610_s28, %s606_s26 }
  0xda   : > { %p608_p8 = pnand %p607_p6, %p802_p12 }
  0xdb   : > { %p613_p11 = por %p612_p5, %p611_p3 }
  0xdc   : > { %p609_p9 = pneg %p608_p8 }
  0xde   : > { %p614_p7 = pnand %p613_p11, %p609_p9 }
  0xe0   : > { %617 = shalt.err (!%p614_p7)
}
  0xe1   : > { %434 = dma.vmem_to_hbm [thread:$0]  (%p802_p12), %s305_s5, 128, %s302_s10, %s290_s19  }
  0xe2 PF: > { %s316_s30 = sand.u32 1, %s660_s12   ;;  %p908_p10 = scmp.ne.s32.totalorder %s896_s21, 0 }
  0xe3   : > { %p909_p13 = scmp.ge.s32.totalorder %s680_s17, 2  ;;  %s317_s20 = scalar_lea.sflag [#allocation4], %s316_s30 }
  0xe5   : > { %p448_p0 = pnand %p909_p13, %p908_p10 }
  0xe7   : > { %p449_p1 = pneg %p448_p0 }
  0xe9   : > { %655 = dma.done.wait (%p449_p1), %s317_s20, 128  }
  0xea   : > { %657 = vsyncadd (%p449_p1), %s317_s20, 4294967168  ;;  %s18_s17 = sadd.s32 1, %s680_s17   ;;  %s910_s12 = smov %s664_s13 }
  0xeb   : > { %p15_p2 = scmp.ge.s32.totalorder %s18_s17, 4   ;;  %s911_s13 = smov %s668_s14 }
  0xec   : > { %s912_s14 = smov %s812_s24  ;;  %s913_s15 = smov %s676_s16 }
  0xed   : > { %s914_s16 = smov %s916_s7  ;;  %17 = sbr.rel (!%p15_p2) target bundleno = 6 (0x6), region = 86 }
  0xf2   :  { %322 = vsyncpa [#allocation3], 1 }
  0xf3   :  { %324 = vsyncpa [#allocation3 + $0x1], 1 }
  0xf4   :  { %325 = vsyncpa [#allocation6], 1 }
  0xf5   :  { %326 = vsyncpa [#allocation4], 1 }
  0xf6   :  { %328 = vsyncpa [#allocation4 + $0x1], 1 }

</bundles_post_ra>
